<compile_context>
chip_gen: v7x
topology: tpu7x:2x2x1
jax: 0.10.0
libtpu: 0.0.40
codegen_flags: <defaults>
</compile_context>

<pallas_src>
import math

import jax
import jax.numpy as jnp
from jax.experimental import pallas as pl
from jax.experimental.pallas import tpu as pltpu

# ----------------------------- module hyper-params ---------------------------
SEQ_LEN = 8
BATCH = 2
D_MODEL = 32
MAX_LEN = 5000           # PyTorch default max_len


# ------------------------- precomputed sinusoidal table ----------------------
def make_sinusoidal_pe(d_model: int, max_len: int) -> jnp.ndarray:
    """(max_len, d_model) sinusoidal table, identical to the PyTorch buffer
    pe[:, 0, :].  Like the PyTorch reference, requires an even d_model."""
    assert d_model % 2 == 0, "PositionalEncoding requires an even d_model"
    position = jnp.arange(max_len, dtype=jnp.float32)[:, None]
    div_term = jnp.exp(jnp.arange(0, d_model, 2, dtype=jnp.float32)
                       * (-math.log(10000.0) / d_model))
    ang = position * div_term                          # (max_len, d_model//2)
    pe = jnp.zeros((max_len, d_model), jnp.float32)
    pe = pe.at[:, 0::2].set(jnp.sin(ang))
    pe = pe.at[:, 1::2].set(jnp.cos(ang))
    return pe


# Module "buffer": computed once at import time, treated as a jit constant.
PE_TABLE = make_sinusoidal_pe(D_MODEL, MAX_LEN)


# --------------------------------- kernel ------------------------------------
def _add_kernel(x_ref, pe_ref, o_ref):
    # Fused "x + pe" on the VPU.  In the 3-D path pe_ref is (block_s, 1, D)
    # and broadcasts over the batch (sublane) axis of x_ref (block_s, B, D);
    # in the flat path both are (block_r, lane).  Dropout is identity in eval.
    o_ref[...] = x_ref[...] + pe_ref[...]


# ------------------------------ tile sizing ----------------------------------
# Conservative live-working-set budget (x2 for double buffering applied below):
# fits v5e's 16 MiB default scoped VMEM as well as v6e/v7x, with headroom.
_VMEM_BUDGET_BYTES = 8 * 1024 * 1024


def _pick_block_rows(n_rows: int, live_bytes_per_row: int) -> int:
    """Largest sublane-aligned row tile whose double-buffered working set fits
    the VMEM budget, with >= 2 grid steps on long inputs (v7x megacore)."""
    if n_rows <= 8:
        return n_rows                                   # full extent, legal
    by_budget = _VMEM_BUDGET_BYTES // max(1, 2 * live_bytes_per_row)
    block = min(by_budget, 1024, n_rows)
    if n_rows >= 16:
        half = ((-(-n_rows // 2)) + 7) // 8 * 8          # ceil(n/2) -> mult of 8
        block = min(block, half)
    return max(8, (block // 8) * 8)


# -------------------------------- forward ------------------------------------
def _pe_fwd_lane_aligned(x: jnp.ndarray, pe_table: jnp.ndarray) -> jnp.ndarray:
    """D % 128 == 0: keep (S, B, D), feed PE un-broadcast as (S, 1, D)."""
    S, B, D = x.shape
    pe = pe_table[:S, None, :].astype(x.dtype)           # (S, 1, D), no batch bcast
    # per sequence-row bytes: x read + out write (B*D each) + pe read (D)
    bytes_per_row = (2 * B + 1) * D * x.dtype.itemsize
    block_s = _pick_block_rows(S, bytes_per_row)
    grid = (pl.cdiv(S, block_s),)
    return pl.pallas_call(
        _add_kernel,
        out_shape=jax.ShapeDtypeStruct((S, B, D), x.dtype),
        grid=grid,
        in_specs=[
            pl.BlockSpec((block_s, B, D), lambda i: (i, 0, 0)),
            pl.BlockSpec((block_s, 1, D), lambda i: (i, 0, 0)),
        ],
        out_specs=pl.BlockSpec((block_s, B, D), lambda i: (i, 0, 0)),
        input_output_aliases={0: 0},
        compiler_params=pltpu.CompilerParams(
            dimension_semantics=("parallel",)),
    )(x, pe)


def _pe_fwd_flat(x: jnp.ndarray, pe_table: jnp.ndarray) -> jnp.ndarray:
    """D not lane-aligned: flatten to a (rows, lane) slab with lane % 128 == 0
    whenever possible so stores are dense vst, not masked vst.msk."""
    S, B, D = x.shape
    total = S * B * D
    lane = next((c for c in (1024, 512, 256, 128) if total % c == 0), B * D)
    rows = total // lane
    x2 = x.reshape(rows, lane)
    # PE broadcast over batch happens only on this non-lane-aligned path and is
    # a jit-time constant fold (demo-scale shapes).
    pe2 = jnp.broadcast_to(pe_table[:S, None, :].astype(x.dtype),
                           (S, B, D)).reshape(rows, lane)
    bytes_per_row = 3 * lane * x.dtype.itemsize          # x read + pe read + out write
    block_r = _pick_block_rows(rows, bytes_per_row)
    grid = (pl.cdiv(rows, block_r),)
    out = pl.pallas_call(
        _add_kernel,
        out_shape=jax.ShapeDtypeStruct((rows, lane), x.dtype),
        grid=grid,
        in_specs=[
            pl.BlockSpec((block_r, lane), lambda i: (i, 0)),
            pl.BlockSpec((block_r, lane), lambda i: (i, 0)),
        ],
        out_specs=pl.BlockSpec((block_r, lane), lambda i: (i, 0)),
        input_output_aliases={0: 0},
        compiler_params=pltpu.CompilerParams(
            dimension_semantics=("parallel",)),
    )(x2, pe2)
    return out.reshape(S, B, D)


def positional_encoding_forward(x: jnp.ndarray, pe_table: jnp.ndarray) -> jnp.ndarray:
    """PositionalEncoding.forward (eval): x + pe[:x.shape[0]].

    x: (seq_len, batch, d_model) -> (seq_len, batch, d_model)
    """
    S, B, D = x.shape
    if D % 128 == 0:
        return _pe_fwd_lane_aligned(x, pe_table)
    return _pe_fwd_flat(x, pe_table)
    # TODO(synk): nn.Dropout(p=0.1) is identity in eval mode; training-mode
    # dropout (with torch RNG semantics) is not reproduced here.


@jax.jit
def forward(x: jnp.ndarray) -> jnp.ndarray:
    return positional_encoding_forward(x, PE_TABLE)


# ---------------------------------- main --------------------------------------
if __name__ == "__main__":
    key = jax.random.PRNGKey(0)

    # Primary demo shape (non-lane-aligned d_model -> flat lane-dense path).
    x = jax.random.normal(key, (SEQ_LEN, BATCH, D_MODEL), jnp.float32)
    out = jax.block_until_ready(forward(x))
    assert out.shape == (SEQ_LEN, BATCH, D_MODEL)
    ref = x + PE_TABLE[:SEQ_LEN, None, :]
    assert bool(jnp.all(jnp.isfinite(out)))
    assert bool(jnp.allclose(out, ref, atol=1e-6, rtol=1e-6))

    # Also exercise the lane-aligned path (un-broadcast PE, d_model = 128).
    d2, s2, b2 = 128, 16, 2
    pe_tbl2 = make_sinusoidal_pe(d2, 64)
    x2 = jax.random.normal(jax.random.PRNGKey(1), (s2, b2, d2), jnp.float32)
    out2 = jax.block_until_ready(
        jax.jit(lambda a: positional_encoding_forward(a, pe_tbl2))(x2))
    ref2 = x2 + pe_tbl2[:s2, None, :]
    assert bool(jnp.allclose(out2, ref2, atol=1e-6, rtol=1e-6))

    print("KERNEL_OK")
</pallas_src>

<mosaic_0001>
module attributes {stable_mosaic.version = 11 : i64} {
  func.func @_add_kernel(%arg0: i32, %arg1: memref<1x512xf32, #tpu.memory_space<vmem>>, %arg2: memref<1x512xf32, #tpu.memory_space<vmem>>, %arg3: memref<1x512xf32, #tpu.memory_space<vmem>>) attributes {dimension_semantics = [#tpu.dimension_semantics<parallel>], iteration_bounds = array<i64: 1>, scalar_prefetch = 0 : i64, scratch_operands = 0 : i64, tpu.core_type = #tpu.core_type<tc>, window_params = [{transform_indices = @transform_0, window_bounds = array<i64: 1, 512>}, {transform_indices = @transform_1, window_bounds = array<i64: 1, 512>}, {transform_indices = @transform_2, window_bounds = array<i64: 1, 512>}]} {
    %c0 = arith.constant 0 : index
    %c0_0 = arith.constant 0 : index
    %0 = vector.load %arg1[%c0, %c0_0] : memref<1x512xf32, #tpu.memory_space<vmem>>, vector<1x512xf32>
    %c0_1 = arith.constant 0 : index
    %c0_2 = arith.constant 0 : index
    %1 = vector.load %arg2[%c0_1, %c0_2] : memref<1x512xf32, #tpu.memory_space<vmem>>, vector<1x512xf32>
    %2 = arith.addf %0, %1 : vector<1x512xf32>
    %c0_3 = arith.constant 0 : index
    %c0_4 = arith.constant 0 : index
    %3 = vector.load %arg3[%c0_3, %c0_4] : memref<1x512xf32, #tpu.memory_space<vmem>>, vector<1x512xf32>
    tpu.vector_store %arg3[%c0_3, %c0_4], %2 {strides = array<i32>} : memref<1x512xf32, #tpu.memory_space<vmem>>, vector<1x512xf32>,
    return
  }
  func.func @transform_0(%arg0: i32) -> (i32, i32) {
    %c0_i32 = arith.constant 0 : i32
    %c0_i32_0 = arith.constant 0 : i32
    return %arg0, %c0_i32 : i32, i32
  }
  func.func @transform_1(%arg0: i32) -> (i32, i32) {
    %c0_i32 = arith.constant 0 : i32
    %c0_i32_0 = arith.constant 0 : i32
    return %arg0, %c0_i32 : i32, i32
  }
  func.func @transform_2(%arg0: i32) -> (i32, i32) {
    %c0_i32 = arith.constant 0 : i32
    %c0_i32_0 = arith.constant 0 : i32
    return %arg0, %c0_i32 : i32, i32
  }
}

</mosaic_0001>

<bundles_post_ra>
// kernel: forward.1
= control target key start
LH: loop header
LB: loop body
LE: loop exit
PB: predicated region body
PF: predicated region fallthrough
CT: control target
= control target key end

     0   :  { %v14_v0 = vlaneseq  ;;  %s47_s0 = inlined_call_operand.vmem [shape: f32[1,512], index: 0, kind: input, shape index: {}, may-alias: {0,2}]   ;;  %s48_s1 = inlined_call_operand.vmem [shape: f32[1,512], index: 1, kind: input, shape index: {}]   ;;  %s49_s2 = inlined_call_operand.vmem [shape: f32[1,512], index: 2, kind: output, shape index: {}, may-alias: {0,2}]  }
   0x1   :  { %v11_v1 = vld [vmem:[%s47_s0] sm:$0xf] }
   0x2   :  { %v12_v2 = vld [vmem:[%s48_s1] sm:$0xf]  ;;  %vm16_vm0 = vcmp.lt.s32.totalorder %v14_v0, 512 }
   0x3   :  { %v13_v3 = vadd.f32 %v12_v2, %v11_v1 }
   0x5   :  { %18 = vst.msk [vmem:[%s49_s2] sm:$0xf] %vm16_vm0, %v13_v3 }

</bundles_post_ra>
